<compile_context>
chip_gen: v6e
topology: v6e:2x2x1
jax: 0.10.0
libtpu: 0.0.40
codegen_flags: <defaults>
</compile_context>

<pallas_src>
import functools
import math

import jax
import jax.numpy as jnp
from jax import lax
from jax.experimental import pallas as pl
from jax.experimental.pallas import tpu as pltpu


def _res_block_kernel(xwin_ref, scale_ref, shift_ref, w2_ref, bias_ref, o_ref,
                      *, dilation, pad, tile_l, valid_l, width):
    """One (batch, L-tile) block of: BN(scale/shift) -> GELU -> dilated conv -> +bias -> +x."""
    t = pl.program_id(1)

    xw = xwin_ref[...]                                    # (Cin, TW) f32; L on the lane axis
    tw = xw.shape[-1]

    # Fused BatchNorm: xn = x * scale + shift (per-channel scale/shift precomputed).
    z = xw * scale_ref[...] + shift_ref[...]              # (Cin, 1) broadcasts over lanes

    # Exact GELU (erf form, matches nn.GELU default).
    g = 0.5 * z * (1.0 + lax.erf(z * (1.0 / math.sqrt(2.0))))

    # Zero the conv-padding / tail-slack positions (PyTorch zero-pads AFTER BN+GELU).
    pos = t * tile_l + lax.broadcasted_iota(jnp.int32, (1, tw), 1)   # global padded position
    g = jnp.where((pos >= pad) & (pos < pad + valid_l), g, 0.0)

    # im2col: stack the `width` dilated taps along the channel (sublane) axis, then do a
    # single MXU matmul over the fused (width*Cin) contraction dim.
    patch = jnp.concatenate(
        [g[:, k * dilation:k * dilation + tile_l] for k in range(width)], axis=0)   # (K*Cin, TL)
    y = jnp.dot(w2_ref[...], patch, preferred_element_type=jnp.float32)             # (Cout, TL)
    y = y + bias_ref[...]                                                            # (Cout, 1)

    # Residual add: raw input values at the output positions (in_channels == out_channels).
    y = y + xw[:, pad:pad + tile_l]

    o_ref[...] = y.astype(o_ref.dtype)


def conv_block_residual(x, gamma, beta, weight, bias, dilation, *, tile_l=None, eps=1e-5):
    """y = x + Conv1d(GELU(BatchNorm1d(x))), 'same' dilated padding (one ResidualModule)."""
    B, Cin, L = x.shape
    Cout, Cin_w, K = weight.shape
    assert Cin_w == Cin and Cout == Cin, "residual block needs in_channels == out_channels"

    pad = dilation * (K - 1) // 2
    if tile_l is None:
        tile_l = int(min(512, 128 * pl.cdiv(L, 128)))     # lane-dense tile, <= 512 lanes
    assert tile_l % 128 == 0
    nt = int(pl.cdiv(L, tile_l))
    tw = tile_l + 2 * pad
    slack = nt * tile_l - L

    xf = x.astype(jnp.float32)

    # BN batch statistics (training-mode, biased var) as one cheap XLA reduction, folded
    # into a per-channel scale/shift so the main kernel is a single fused, tileable pass.
    mean = jnp.mean(xf, axis=(0, 2))
    var = jnp.maximum(jnp.mean(xf * xf, axis=(0, 2)) - mean * mean, 0.0)
    scale = gamma.astype(jnp.float32) * lax.rsqrt(var + eps)
    shift = beta.astype(jnp.float32) - mean * scale

    # Slightly overlapping input windows (overlap = conv padding halo) so each grid step
    # gets exactly the data it needs; removes the zeroed padded VMEM scratch entirely.
    xp = jnp.pad(xf, ((0, 0), (0, 0), (pad, pad + slack)))
    xwin = jnp.stack([xp[:, :, t * tile_l: t * tile_l + tw] for t in range(nt)], axis=1)

    # Conv weight reshaped for a single matmul: row order = k*Cin + c.
    w2 = jnp.transpose(weight.astype(jnp.float32), (0, 2, 1)).reshape(Cout, K * Cin)

    kernel = functools.partial(_res_block_kernel, dilation=dilation, pad=pad,
                               tile_l=tile_l, valid_l=L, width=K)

    # Explicit VMEM budget from the tile sizes (double-buffered input/output + params).
    x_blk = Cin * tw * 4
    o_blk = Cout * tile_l * 4
    par = (2 * Cin + Cout * K * Cin + Cout) * 4
    vmem_limit = int(min(max(2 * (x_blk + o_blk) + 2 * par + (1 << 20), 16 * 2**20), 48 * 2**20))

    out = pl.pallas_call(
        kernel,
        out_shape=jax.ShapeDtypeStruct((B, Cout, nt * tile_l), x.dtype),
        grid_spec=pltpu.PrefetchScalarGridSpec(
            num_scalar_prefetch=0,
            grid=(B, nt),
            in_specs=[
                pl.BlockSpec((None, None, Cin, tw), lambda b, t: (b, t, 0, 0)),
                pl.BlockSpec((Cin, 1), lambda b, t: (0, 0)),
                pl.BlockSpec((Cin, 1), lambda b, t: (0, 0)),
                pl.BlockSpec((Cout, K * Cin), lambda b, t: (0, 0)),
                pl.BlockSpec((Cout, 1), lambda b, t: (0, 0)),
            ],
            out_specs=pl.BlockSpec((None, Cout, tile_l), lambda b, t: (b, 0, t)),
        ),
        compiler_params=pltpu.CompilerParams(
            dimension_semantics=("parallel", "parallel"),
            vmem_limit_bytes=vmem_limit),
    )(xwin,
      scale.reshape(Cin, 1),
      shift.reshape(Cin, 1),
      w2,
      bias.astype(jnp.float32).reshape(Cout, 1))

    return out[:, :, :L]


def dilated_conv_stack_forward(x, params, dilations, *, tile_l=None):
    """DilatedConvStack.forward: sequence of ResidualModules (ConvBlock + Dropout + identity)."""
    for (gamma, beta, weight, bias), d in zip(params, dilations):
        x = conv_block_residual(x, gamma, beta, weight, bias, d, tile_l=tile_l)
        # TODO(synk): nn.Dropout(p=0.3) is identity in eval mode; training-mode RNG mask omitted.
    return x


def make_dilations(layers_num, dilation_rate=1, multi_dilated=1.5):
    ds, cur = [], dilation_rate
    for _ in range(layers_num):
        ds.append(cur)
        cur = int(multi_dilated * cur)
    return ds


def _reference_stack(x, params, dilations, eps=1e-5):
    """Pure-JAX reference of the same forward (training-mode BN, exact GELU, eval dropout)."""
    for (gamma, beta, weight, bias), d in zip(params, dilations):
        mean = jnp.mean(x, axis=(0, 2), keepdims=True)
        var = jnp.mean((x - mean) ** 2, axis=(0, 2), keepdims=True)
        xn = (x - mean) / jnp.sqrt(var + eps)
        xn = xn * gamma[None, :, None] + beta[None, :, None]
        g = 0.5 * xn * (1.0 + lax.erf(xn / math.sqrt(2.0)))
        K = weight.shape[2]
        pad = d * (K - 1) // 2
        y = lax.conv_general_dilated(
            g, weight, window_strides=(1,), padding=[(pad, pad)],
            rhs_dilation=(d,), dimension_numbers=('NCH', 'OIH', 'NCH'))
        x = y + bias[None, :, None] + x
    return x


if __name__ == "__main__":
    # Small deterministic example: channels=8, L=320 (non-multiple of the 128-tile to
    # exercise left/right masking and tail slack), 4 layers, dilation_rate=2 -> dilations 2,3,4,6.
    B, C, L = 2, 8, 320
    layers_num, dilation_rate, multi_dilated, width = 4, 2, 1.5, 3
    dilations = make_dilations(layers_num, dilation_rate, multi_dilated)

    key = jax.random.PRNGKey(0)
    params = []
    bound = 1.0 / math.sqrt(C * width)   # Conv1d default init bound (deterministic here)
    for _ in dilations:
        key, kg, kb, kw, kbi = jax.random.split(key, 5)
        gamma = 1.0 + 0.1 * jax.random.normal(kg, (C,), dtype=jnp.float32)
        beta = 0.1 * jax.random.normal(kb, (C,), dtype=jnp.float32)
        weight = jax.random.uniform(kw, (C, C, width), jnp.float32, -bound, bound)
        bias = jax.random.uniform(kbi, (C,), jnp.float32, -bound, bound)
        params.append((gamma, beta, weight, bias))
    key, kx = jax.random.split(key)
    x = jax.random.normal(kx, (B, C, L), dtype=jnp.float32)

    fwd = jax.jit(lambda xx, pp: dilated_conv_stack_forward(xx, pp, dilations, tile_l=128))
    y = jax.block_until_ready(fwd(x, params))

    y_ref = _reference_stack(x, params, dilations)
    assert y.shape == (B, C, L), y.shape
    err = float(jnp.max(jnp.abs(y - y_ref)))
    assert jnp.allclose(y, y_ref, atol=2e-3, rtol=2e-3), err

    print("KERNEL_OK")
</pallas_src>

<mosaic_0001>
module attributes {stable_mosaic.version = 11 : i64} {
  func.func @_res_block_kernel(%arg0: i32, %arg1: i32, %arg2: memref<1x1x8x132xf32, #tpu.memory_space<vmem>>, %arg3: memref<8x1xf32, #tpu.memory_space<vmem>>, %arg4: memref<8x1xf32, #tpu.memory_space<vmem>>, %arg5: memref<8x24xf32, #tpu.memory_space<vmem>>, %arg6: memref<8x1xf32, #tpu.memory_space<vmem>>, %arg7: memref<1x8x128xf32, #tpu.memory_space<vmem>>) attributes {dimension_semantics = [#tpu.dimension_semantics<parallel>, #tpu.dimension_semantics<parallel>], iteration_bounds = array<i64: 2, 3>, scalar_prefetch = 0 : i64, scratch_operands = 0 : i64, tpu.core_type = #tpu.core_type<tc>, window_params = [{transform_indices = @transform_0, window_bounds = array<i64: 1, 1, 8, 132>}, {pipeline_mode = #tpu.pipeline_mode<synchronous>, transform_indices = @transform_1, window_bounds = array<i64: 8, 1>}, {pipeline_mode = #tpu.pipeline_mode<synchronous>, transform_indices = @transform_2, window_bounds = array<i64: 8, 1>}, {pipeline_mode = #tpu.pipeline_mode<synchronous>, transform_indices = @transform_3, window_bounds = array<i64: 8, 24>}, {pipeline_mode = #tpu.pipeline_mode<synchronous>, transform_indices = @transform_4, window_bounds = array<i64: 8, 1>}, {transform_indices = @transform_5, window_bounds = array<i64: 1, 8, 128>}]} {
    %c0 = arith.constant 0 : index
    %c0_0 = arith.constant 0 : index
    %c0_1 = arith.constant 0 : index
    %c0_2 = arith.constant 0 : index
    %0 = vector.load %arg2[%c0, %c0_0, %c0_1, %c0_2] : memref<1x1x8x132xf32, #tpu.memory_space<vmem>>, vector<1x1x8x132xf32>
    %1 = vector.shape_cast %0 : vector<1x1x8x132xf32> to vector<8x132xf32>
    %c0_3 = arith.constant 0 : index
    %c0_4 = arith.constant 0 : index
    %2 = vector.load %arg3[%c0_3, %c0_4] : memref<8x1xf32, #tpu.memory_space<vmem>>, vector<8x1xf32>
    %3 = vector.broadcast %2 : vector<8x1xf32> to vector<8x132xf32>
    %4 = arith.mulf %1, %3 : vector<8x132xf32>
    %c0_5 = arith.constant 0 : index
    %c0_6 = arith.constant 0 : index
    %5 = vector.load %arg4[%c0_5, %c0_6] : memref<8x1xf32, #tpu.memory_space<vmem>>, vector<8x1xf32>
    %6 = vector.broadcast %5 : vector<8x1xf32> to vector<8x132xf32>
    %7 = arith.addf %4, %6 : vector<8x132xf32>
    %cst = arith.constant 5.000000e-01 : f32
    %8 = vector.broadcast %cst : f32 to vector<8x132xf32>
    %9 = arith.mulf %8, %7 : vector<8x132xf32>
    %cst_7 = arith.constant 0.707106769 : f32
    %10 = vector.broadcast %cst_7 : f32 to vector<8x132xf32>
    %11 = arith.mulf %7, %10 : vector<8x132xf32>
    %12 = math.erf %11 : vector<8x132xf32>
    %cst_8 = arith.constant 1.000000e+00 : f32
    %13 = vector.broadcast %cst_8 : f32 to vector<8x132xf32>
    %14 = arith.addf %13, %12 : vector<8x132xf32>
    %15 = arith.mulf %9, %14 : vector<8x132xf32>
    %c128_i32 = arith.constant 128 : i32
    %16 = arith.muli %arg1, %c128_i32 : i32
    %17 = tpu.iota {dimensions = array<i32: 1>} : vector<1x132xi32>
    %18 = vector.broadcast %16 : i32 to vector<1x132xi32>
    %19 = arith.addi %18, %17 : vector<1x132xi32>
    %c2_i32 = arith.constant 2 : i32
    %20 = vector.broadcast %c2_i32 : i32 to vector<1x132xi32>
    %21 = arith.cmpi sge, %19, %20 : vector<1x132xi32>
    %c322_i32 = arith.constant 322 : i32
    %22 = vector.broadcast %c322_i32 : i32 to vector<1x132xi32>
    %23 = arith.cmpi slt, %19, %22 : vector<1x132xi32>
    %24 = arith.andi %21, %23 : vector<1x132xi1>
    %cst_9 = arith.constant 0.000000e+00 : f32
    %25 = vector.shape_cast %24 : vector<1x132xi1> to vector<1x132xi1>
    %26 = vector.broadcast %25 : vector<1x132xi1> to vector<8x132xi1>
    %27 = vector.broadcast %cst_9 : f32 to vector<8x132xf32>
    %28 = arith.select %26, %15, %27 : vector<8x132xi1>, vector<8x132xf32>
    %29 = vector.extract_strided_slice %28 {offsets = [0, 0], sizes = [8, 128], strides = [1, 1]} : vector<8x132xf32> to vector<8x128xf32>
    %30 = vector.extract_strided_slice %28 {offsets = [0, 2], sizes = [8, 128], strides = [1, 1]} : vector<8x132xf32> to vector<8x128xf32>
    %31 = vector.extract_strided_slice %28 {offsets = [0, 4], sizes = [8, 128], strides = [1, 1]} : vector<8x132xf32> to vector<8x128xf32>
    %32 = tpu.concatenate %29, %30, %31 in 0 : vector<8x128xf32>, vector<8x128xf32>, vector<8x128xf32> -> vector<24x128xf32>
    %c0_10 = arith.constant 0 : index
    %c0_11 = arith.constant 0 : index
    %33 = vector.load %arg5[%c0_10, %c0_11] : memref<8x24xf32, #tpu.memory_space<vmem>>, vector<8x24xf32>
    %cst_12 = arith.constant dense<0.000000e+00> : vector<8x128xf32>
    %34 = tpu.matmul %33, %32, %cst_12 {dimension_numbers = #tpu.dot_dimension_numbers<[1], [0], [0], [1], [0, 0, 1, 1], [], []>} : vector<8x24xf32>, vector<24x128xf32>, vector<8x128xf32> -> vector<8x128xf32>
    %c0_13 = arith.constant 0 : index
    %c0_14 = arith.constant 0 : index
    %35 = vector.load %arg6[%c0_13, %c0_14] : memref<8x1xf32, #tpu.memory_space<vmem>>, vector<8x1xf32>
    %36 = vector.broadcast %35 : vector<8x1xf32> to vector<8x128xf32>
    %37 = arith.addf %34, %36 : vector<8x128xf32>
    %38 = vector.extract_strided_slice %1 {offsets = [0, 2], sizes = [8, 128], strides = [1, 1]} : vector<8x132xf32> to vector<8x128xf32>
    %39 = arith.addf %37, %38 : vector<8x128xf32>
    %c0_15 = arith.constant 0 : index
    %c0_16 = arith.constant 0 : index
    %c0_17 = arith.constant 0 : index
    %40 = vector.load %arg7[%c0_15, %c0_16, %c0_17] : memref<1x8x128xf32, #tpu.memory_space<vmem>>, vector<1x8x128xf32>
    %41 = vector.shape_cast %40 : vector<1x8x128xf32> to vector<8x128xf32>
    %42 = vector.shape_cast %39 : vector<8x128xf32> to vector<1x8x128xf32>
    tpu.vector_store %arg7[%c0_15, %c0_16, %c0_17], %42 {strides = array<i32>} : memref<1x8x128xf32, #tpu.memory_space<vmem>>, vector<1x8x128xf32>,
    return
  }
  func.func @transform_0(%arg0: i32, %arg1: i32) -> (i32, i32, i32, i32) {
    %c0_i32 = arith.constant 0 : i32
    %c0_i32_0 = arith.constant 0 : i32
    %c0_i32_1 = arith.constant 0 : i32
    return %arg0, %arg1, %c0_i32, %c0_i32_0 : i32, i32, i32, i32
  }
  func.func @transform_1(%arg0: i32, %arg1: i32) -> (i32, i32) {
    %c0_i32 = arith.constant 0 : i32
    %c0_i32_0 = arith.constant 0 : i32
    %c0_i32_1 = arith.constant 0 : i32
    return %c0_i32, %c0_i32_0 : i32, i32
  }
  func.func @transform_2(%arg0: i32, %arg1: i32) -> (i32, i32) {
    %c0_i32 = arith.constant 0 : i32
    %c0_i32_0 = arith.constant 0 : i32
    %c0_i32_1 = arith.constant 0 : i32
    return %c0_i32, %c0_i32_0 : i32, i32
  }
  func.func @transform_3(%arg0: i32, %arg1: i32) -> (i32, i32) {
    %c0_i32 = arith.constant 0 : i32
    %c0_i32_0 = arith.constant 0 : i32
    %c0_i32_1 = arith.constant 0 : i32
    return %c0_i32, %c0_i32_0 : i32, i32
  }
  func.func @transform_4(%arg0: i32, %arg1: i32) -> (i32, i32) {
    %c0_i32 = arith.constant 0 : i32
    %c0_i32_0 = arith.constant 0 : i32
    %c0_i32_1 = arith.constant 0 : i32
    return %c0_i32, %c0_i32_0 : i32, i32
  }
  func.func @transform_5(%arg0: i32, %arg1: i32) -> (i32, i32, i32) {
    %c0_i32 = arith.constant 0 : i32
    %c0_i32_0 = arith.constant 0 : i32
    return %arg0, %c0_i32, %arg1 : i32, i32, i32
  }
}

module attributes {stable_mosaic.version = 11 : i64} {
  func.func @_res_block_kernel(%arg0: i32, %arg1: i32, %arg2: memref<1x1x8x134xf32, #tpu.memory_space<vmem>>, %arg3: memref<8x1xf32, #tpu.memory_space<vmem>>, %arg4: memref<8x1xf32, #tpu.memory_space<vmem>>, %arg5: memref<8x24xf32, #tpu.memory_space<vmem>>, %arg6: memref<8x1xf32, #tpu.memory_space<vmem>>, %arg7: memref<1x8x128xf32, #tpu.memory_space<vmem>>) attributes {dimension_semantics = [#tpu.dimension_semantics<parallel>, #tpu.dimension_semantics<parallel>], iteration_bounds = array<i64: 2, 3>, scalar_prefetch = 0 : i64, scratch_operands = 0 : i64, tpu.core_type = #tpu.core_type<tc>, window_params = [{transform_indices = @transform_0, window_bounds = array<i64: 1, 1, 8, 134>}, {pipeline_mode = #tpu.pipeline_mode<synchronous>, transform_indices = @transform_1, window_bounds = array<i64: 8, 1>}, {pipeline_mode = #tpu.pipeline_mode<synchronous>, transform_indices = @transform_2, window_bounds = array<i64: 8, 1>}, {pipeline_mode = #tpu.pipeline_mode<synchronous>, transform_indices = @transform_3, window_bounds = array<i64: 8, 24>}, {pipeline_mode = #tpu.pipeline_mode<synchronous>, transform_indices = @transform_4, window_bounds = array<i64: 8, 1>}, {transform_indices = @transform_5, window_bounds = array<i64: 1, 8, 128>}]} {
    %c0 = arith.constant 0 : index
    %c0_0 = arith.constant 0 : index
    %c0_1 = arith.constant 0 : index
    %c0_2 = arith.constant 0 : index
    %0 = vector.load %arg2[%c0, %c0_0, %c0_1, %c0_2] : memref<1x1x8x134xf32, #tpu.memory_space<vmem>>, vector<1x1x8x134xf32>
    %1 = vector.shape_cast %0 : vector<1x1x8x134xf32> to vector<8x134xf32>
    %c0_3 = arith.constant 0 : index
    %c0_4 = arith.constant 0 : index
    %2 = vector.load %arg3[%c0_3, %c0_4] : memref<8x1xf32, #tpu.memory_space<vmem>>, vector<8x1xf32>
    %3 = vector.broadcast %2 : vector<8x1xf32> to vector<8x134xf32>
    %4 = arith.mulf %1, %3 : vector<8x134xf32>
    %c0_5 = arith.constant 0 : index
    %c0_6 = arith.constant 0 : index
    %5 = vector.load %arg4[%c0_5, %c0_6] : memref<8x1xf32, #tpu.memory_space<vmem>>, vector<8x1xf32>
    %6 = vector.broadcast %5 : vector<8x1xf32> to vector<8x134xf32>
    %7 = arith.addf %4, %6 : vector<8x134xf32>
    %cst = arith.constant 5.000000e-01 : f32
    %8 = vector.broadcast %cst : f32 to vector<8x134xf32>
    %9 = arith.mulf %8, %7 : vector<8x134xf32>
    %cst_7 = arith.constant 0.707106769 : f32
    %10 = vector.broadcast %cst_7 : f32 to vector<8x134xf32>
    %11 = arith.mulf %7, %10 : vector<8x134xf32>
    %12 = math.erf %11 : vector<8x134xf32>
    %cst_8 = arith.constant 1.000000e+00 : f32
    %13 = vector.broadcast %cst_8 : f32 to vector<8x134xf32>
    %14 = arith.addf %13, %12 : vector<8x134xf32>
    %15 = arith.mulf %9, %14 : vector<8x134xf32>
    %c128_i32 = arith.constant 128 : i32
    %16 = arith.muli %arg1, %c128_i32 : i32
    %17 = tpu.iota {dimensions = array<i32: 1>} : vector<1x134xi32>
    %18 = vector.broadcast %16 : i32 to vector<1x134xi32>
    %19 = arith.addi %18, %17 : vector<1x134xi32>
    %c3_i32 = arith.constant 3 : i32
    %20 = vector.broadcast %c3_i32 : i32 to vector<1x134xi32>
    %21 = arith.cmpi sge, %19, %20 : vector<1x134xi32>
    %c323_i32 = arith.constant 323 : i32
    %22 = vector.broadcast %c323_i32 : i32 to vector<1x134xi32>
    %23 = arith.cmpi slt, %19, %22 : vector<1x134xi32>
    %24 = arith.andi %21, %23 : vector<1x134xi1>
    %cst_9 = arith.constant 0.000000e+00 : f32
    %25 = vector.shape_cast %24 : vector<1x134xi1> to vector<1x134xi1>
    %26 = vector.broadcast %25 : vector<1x134xi1> to vector<8x134xi1>
    %27 = vector.broadcast %cst_9 : f32 to vector<8x134xf32>
    %28 = arith.select %26, %15, %27 : vector<8x134xi1>, vector<8x134xf32>
    %29 = vector.extract_strided_slice %28 {offsets = [0, 0], sizes = [8, 128], strides = [1, 1]} : vector<8x134xf32> to vector<8x128xf32>
    %30 = vector.extract_strided_slice %28 {offsets = [0, 3], sizes = [8, 128], strides = [1, 1]} : vector<8x134xf32> to vector<8x128xf32>
    %31 = vector.extract_strided_slice %28 {offsets = [0, 6], sizes = [8, 128], strides = [1, 1]} : vector<8x134xf32> to vector<8x128xf32>
    %32 = tpu.concatenate %29, %30, %31 in 0 : vector<8x128xf32>, vector<8x128xf32>, vector<8x128xf32> -> vector<24x128xf32>
    %c0_10 = arith.constant 0 : index
    %c0_11 = arith.constant 0 : index
    %33 = vector.load %arg5[%c0_10, %c0_11] : memref<8x24xf32, #tpu.memory_space<vmem>>, vector<8x24xf32>
    %cst_12 = arith.constant dense<0.000000e+00> : vector<8x128xf32>
    %34 = tpu.matmul %33, %32, %cst_12 {dimension_numbers = #tpu.dot_dimension_numbers<[1], [0], [0], [1], [0, 0, 1, 1], [], []>} : vector<8x24xf32>, vector<24x128xf32>, vector<8x128xf32> -> vector<8x128xf32>
    %c0_13 = arith.constant 0 : index
    %c0_14 = arith.constant 0 : index
    %35 = vector.load %arg6[%c0_13, %c0_14] : memref<8x1xf32, #tpu.memory_space<vmem>>, vector<8x1xf32>
    %36 = vector.broadcast %35 : vector<8x1xf32> to vector<8x128xf32>
    %37 = arith.addf %34, %36 : vector<8x128xf32>
    %38 = vector.extract_strided_slice %1 {offsets = [0, 3], sizes = [8, 128], strides = [1, 1]} : vector<8x134xf32> to vector<8x128xf32>
    %39 = arith.addf %37, %38 : vector<8x128xf32>
    %c0_15 = arith.constant 0 : index
    %c0_16 = arith.constant 0 : index
    %c0_17 = arith.constant 0 : index
    %40 = vector.load %arg7[%c0_15, %c0_16, %c0_17] : memref<1x8x128xf32, #tpu.memory_space<vmem>>, vector<1x8x128xf32>
    %41 = vector.shape_cast %40 : vector<1x8x128xf32> to vector<8x128xf32>
    %42 = vector.shape_cast %39 : vector<8x128xf32> to vector<1x8x128xf32>
    tpu.vector_store %arg7[%c0_15, %c0_16, %c0_17], %42 {strides = array<i32>} : memref<1x8x128xf32, #tpu.memory_space<vmem>>, vector<1x8x128xf32>,
    return
  }
  func.func @transform_0(%arg0: i32, %arg1: i32) -> (i32, i32, i32, i32) {
    %c0_i32 = arith.constant 0 : i32
    %c0_i32_0 = arith.constant 0 : i32
    %c0_i32_1 = arith.constant 0 : i32
    return %arg0, %arg1, %c0_i32, %c0_i32_0 : i32, i32, i32, i32
  }
  func.func @transform_1(%arg0: i32, %arg1: i32) -> (i32, i32) {
    %c0_i32 = arith.constant 0 : i32
    %c0_i32_0 = arith.constant 0 : i32
    %c0_i32_1 = arith.constant 0 : i32
    return %c0_i32, %c0_i32_0 : i32, i32
  }
  func.func @transform_2(%arg0: i32, %arg1: i32) -> (i32, i32) {
    %c0_i32 = arith.constant 0 : i32
    %c0_i32_0 = arith.constant 0 : i32
    %c0_i32_1 = arith.constant 0 : i32
    return %c0_i32, %c0_i32_0 : i32, i32
  }
  func.func @transform_3(%arg0: i32, %arg1: i32) -> (i32, i32) {
    %c0_i32 = arith.constant 0 : i32
    %c0_i32_0 = arith.constant 0 : i32
    %c0_i32_1 = arith.constant 0 : i32
    return %c0_i32, %c0_i32_0 : i32, i32
  }
  func.func @transform_4(%arg0: i32, %arg1: i32) -> (i32, i32) {
    %c0_i32 = arith.constant 0 : i32
    %c0_i32_0 = arith.constant 0 : i32
    %c0_i32_1 = arith.constant 0 : i32
    return %c0_i32, %c0_i32_0 : i32, i32
  }
  func.func @transform_5(%arg0: i32, %arg1: i32) -> (i32, i32, i32) {
    %c0_i32 = arith.constant 0 : i32
    %c0_i32_0 = arith.constant 0 : i32
    return %arg0, %c0_i32, %arg1 : i32, i32, i32
  }
}

module attributes {stable_mosaic.version = 11 : i64} {
  func.func @_res_block_kernel(%arg0: i32, %arg1: i32, %arg2: memref<1x1x8x136xf32, #tpu.memory_space<vmem>>, %arg3: memref<8x1xf32, #tpu.memory_space<vmem>>, %arg4: memref<8x1xf32, #tpu.memory_space<vmem>>, %arg5: memref<8x24xf32, #tpu.memory_space<vmem>>, %arg6: memref<8x1xf32, #tpu.memory_space<vmem>>, %arg7: memref<1x8x128xf32, #tpu.memory_space<vmem>>) attributes {dimension_semantics = [#tpu.dimension_semantics<parallel>, #tpu.dimension_semantics<parallel>], iteration_bounds = array<i64: 2, 3>, scalar_prefetch = 0 : i64, scratch_operands = 0 : i64, tpu.core_type = #tpu.core_type<tc>, window_params = [{transform_indices = @transform_0, window_bounds = array<i64: 1, 1, 8, 136>}, {pipeline_mode = #tpu.pipeline_mode<synchronous>, transform_indices = @transform_1, window_bounds = array<i64: 8, 1>}, {pipeline_mode = #tpu.pipeline_mode<synchronous>, transform_indices = @transform_2, window_bounds = array<i64: 8, 1>}, {pipeline_mode = #tpu.pipeline_mode<synchronous>, transform_indices = @transform_3, window_bounds = array<i64: 8, 24>}, {pipeline_mode = #tpu.pipeline_mode<synchronous>, transform_indices = @transform_4, window_bounds = array<i64: 8, 1>}, {transform_indices = @transform_5, window_bounds = array<i64: 1, 8, 128>}]} {
    %c0 = arith.constant 0 : index
    %c0_0 = arith.constant 0 : index
    %c0_1 = arith.constant 0 : index
    %c0_2 = arith.constant 0 : index
    %0 = vector.load %arg2[%c0, %c0_0, %c0_1, %c0_2] : memref<1x1x8x136xf32, #tpu.memory_space<vmem>>, vector<1x1x8x136xf32>
    %1 = vector.shape_cast %0 : vector<1x1x8x136xf32> to vector<8x136xf32>
    %c0_3 = arith.constant 0 : index
    %c0_4 = arith.constant 0 : index
    %2 = vector.load %arg3[%c0_3, %c0_4] : memref<8x1xf32, #tpu.memory_space<vmem>>, vector<8x1xf32>
    %3 = vector.broadcast %2 : vector<8x1xf32> to vector<8x136xf32>
    %4 = arith.mulf %1, %3 : vector<8x136xf32>
    %c0_5 = arith.constant 0 : index
    %c0_6 = arith.constant 0 : index
    %5 = vector.load %arg4[%c0_5, %c0_6] : memref<8x1xf32, #tpu.memory_space<vmem>>, vector<8x1xf32>
    %6 = vector.broadcast %5 : vector<8x1xf32> to vector<8x136xf32>
    %7 = arith.addf %4, %6 : vector<8x136xf32>
    %cst = arith.constant 5.000000e-01 : f32
    %8 = vector.broadcast %cst : f32 to vector<8x136xf32>
    %9 = arith.mulf %8, %7 : vector<8x136xf32>
    %cst_7 = arith.constant 0.707106769 : f32
    %10 = vector.broadcast %cst_7 : f32 to vector<8x136xf32>
    %11 = arith.mulf %7, %10 : vector<8x136xf32>
    %12 = math.erf %11 : vector<8x136xf32>
    %cst_8 = arith.constant 1.000000e+00 : f32
    %13 = vector.broadcast %cst_8 : f32 to vector<8x136xf32>
    %14 = arith.addf %13, %12 : vector<8x136xf32>
    %15 = arith.mulf %9, %14 : vector<8x136xf32>
    %c128_i32 = arith.constant 128 : i32
    %16 = arith.muli %arg1, %c128_i32 : i32
    %17 = tpu.iota {dimensions = array<i32: 1>} : vector<1x136xi32>
    %18 = vector.broadcast %16 : i32 to vector<1x136xi32>
    %19 = arith.addi %18, %17 : vector<1x136xi32>
    %c4_i32 = arith.constant 4 : i32
    %20 = vector.broadcast %c4_i32 : i32 to vector<1x136xi32>
    %21 = arith.cmpi sge, %19, %20 : vector<1x136xi32>
    %c324_i32 = arith.constant 324 : i32
    %22 = vector.broadcast %c324_i32 : i32 to vector<1x136xi32>
    %23 = arith.cmpi slt, %19, %22 : vector<1x136xi32>
    %24 = arith.andi %21, %23 : vector<1x136xi1>
    %cst_9 = arith.constant 0.000000e+00 : f32
    %25 = vector.shape_cast %24 : vector<1x136xi1> to vector<1x136xi1>
    %26 = vector.broadcast %25 : vector<1x136xi1> to vector<8x136xi1>
    %27 = vector.broadcast %cst_9 : f32 to vector<8x136xf32>
    %28 = arith.select %26, %15, %27 : vector<8x136xi1>, vector<8x136xf32>
    %29 = vector.extract_strided_slice %28 {offsets = [0, 0], sizes = [8, 128], strides = [1, 1]} : vector<8x136xf32> to vector<8x128xf32>
    %30 = vector.extract_strided_slice %28 {offsets = [0, 4], sizes = [8, 128], strides = [1, 1]} : vector<8x136xf32> to vector<8x128xf32>
    %31 = vector.extract_strided_slice %28 {offsets = [0, 8], sizes = [8, 128], strides = [1, 1]} : vector<8x136xf32> to vector<8x128xf32>
    %32 = tpu.concatenate %29, %30, %31 in 0 : vector<8x128xf32>, vector<8x128xf32>, vector<8x128xf32> -> vector<24x128xf32>
    %c0_10 = arith.constant 0 : index
    %c0_11 = arith.constant 0 : index
    %33 = vector.load %arg5[%c0_10, %c0_11] : memref<8x24xf32, #tpu.memory_space<vmem>>, vector<8x24xf32>
    %cst_12 = arith.constant dense<0.000000e+00> : vector<8x128xf32>
    %34 = tpu.matmul %33, %32, %cst_12 {dimension_numbers = #tpu.dot_dimension_numbers<[1], [0], [0], [1], [0, 0, 1, 1], [], []>} : vector<8x24xf32>, vector<24x128xf32>, vector<8x128xf32> -> vector<8x128xf32>
    %c0_13 = arith.constant 0 : index
    %c0_14 = arith.constant 0 : index
    %35 = vector.load %arg6[%c0_13, %c0_14] : memref<8x1xf32, #tpu.memory_space<vmem>>, vector<8x1xf32>
    %36 = vector.broadcast %35 : vector<8x1xf32> to vector<8x128xf32>
    %37 = arith.addf %34, %36 : vector<8x128xf32>
    %38 = vector.extract_strided_slice %1 {offsets = [0, 4], sizes = [8, 128], strides = [1, 1]} : vector<8x136xf32> to vector<8x128xf32>
    %39 = arith.addf %37, %38 : vector<8x128xf32>
    %c0_15 = arith.constant 0 : index
    %c0_16 = arith.constant 0 : index
    %c0_17 = arith.constant 0 : index
    %40 = vector.load %arg7[%c0_15, %c0_16, %c0_17] : memref<1x8x128xf32, #tpu.memory_space<vmem>>, vector<1x8x128xf32>
    %41 = vector.shape_cast %40 : vector<1x8x128xf32> to vector<8x128xf32>
    %42 = vector.shape_cast %39 : vector<8x128xf32> to vector<1x8x128xf32>
    tpu.vector_store %arg7[%c0_15, %c0_16, %c0_17], %42 {strides = array<i32>} : memref<1x8x128xf32, #tpu.memory_space<vmem>>, vector<1x8x128xf32>,
    return
  }
  func.func @transform_0(%arg0: i32, %arg1: i32) -> (i32, i32, i32, i32) {
    %c0_i32 = arith.constant 0 : i32
    %c0_i32_0 = arith.constant 0 : i32
    %c0_i32_1 = arith.constant 0 : i32
    return %arg0, %arg1, %c0_i32, %c0_i32_0 : i32, i32, i32, i32
  }
  func.func @transform_1(%arg0: i32, %arg1: i32) -> (i32, i32) {
    %c0_i32 = arith.constant 0 : i32
    %c0_i32_0 = arith.constant 0 : i32
    %c0_i32_1 = arith.constant 0 : i32
    return %c0_i32, %c0_i32_0 : i32, i32
  }
  func.func @transform_2(%arg0: i32, %arg1: i32) -> (i32, i32) {
    %c0_i32 = arith.constant 0 : i32
    %c0_i32_0 = arith.constant 0 : i32
    %c0_i32_1 = arith.constant 0 : i32
    return %c0_i32, %c0_i32_0 : i32, i32
  }
  func.func @transform_3(%arg0: i32, %arg1: i32) -> (i32, i32) {
    %c0_i32 = arith.constant 0 : i32
    %c0_i32_0 = arith.constant 0 : i32
    %c0_i32_1 = arith.constant 0 : i32
    return %c0_i32, %c0_i32_0 : i32, i32
  }
  func.func @transform_4(%arg0: i32, %arg1: i32) -> (i32, i32) {
    %c0_i32 = arith.constant 0 : i32
    %c0_i32_0 = arith.constant 0 : i32
    %c0_i32_1 = arith.constant 0 : i32
    return %c0_i32, %c0_i32_0 : i32, i32
  }
  func.func @transform_5(%arg0: i32, %arg1: i32) -> (i32, i32, i32) {
    %c0_i32 = arith.constant 0 : i32
    %c0_i32_0 = arith.constant 0 : i32
    return %arg0, %c0_i32, %arg1 : i32, i32, i32
  }
}

module attributes {stable_mosaic.version = 11 : i64} {
  func.func @_res_block_kernel(%arg0: i32, %arg1: i32, %arg2: memref<1x1x8x140xf32, #tpu.memory_space<vmem>>, %arg3: memref<8x1xf32, #tpu.memory_space<vmem>>, %arg4: memref<8x1xf32, #tpu.memory_space<vmem>>, %arg5: memref<8x24xf32, #tpu.memory_space<vmem>>, %arg6: memref<8x1xf32, #tpu.memory_space<vmem>>, %arg7: memref<1x8x128xf32, #tpu.memory_space<vmem>>) attributes {dimension_semantics = [#tpu.dimension_semantics<parallel>, #tpu.dimension_semantics<parallel>], iteration_bounds = array<i64: 2, 3>, scalar_prefetch = 0 : i64, scratch_operands = 0 : i64, tpu.core_type = #tpu.core_type<tc>, window_params = [{transform_indices = @transform_0, window_bounds = array<i64: 1, 1, 8, 140>}, {pipeline_mode = #tpu.pipeline_mode<synchronous>, transform_indices = @transform_1, window_bounds = array<i64: 8, 1>}, {pipeline_mode = #tpu.pipeline_mode<synchronous>, transform_indices = @transform_2, window_bounds = array<i64: 8, 1>}, {pipeline_mode = #tpu.pipeline_mode<synchronous>, transform_indices = @transform_3, window_bounds = array<i64: 8, 24>}, {pipeline_mode = #tpu.pipeline_mode<synchronous>, transform_indices = @transform_4, window_bounds = array<i64: 8, 1>}, {transform_indices = @transform_5, window_bounds = array<i64: 1, 8, 128>}]} {
    %c0 = arith.constant 0 : index
    %c0_0 = arith.constant 0 : index
    %c0_1 = arith.constant 0 : index
    %c0_2 = arith.constant 0 : index
    %0 = vector.load %arg2[%c0, %c0_0, %c0_1, %c0_2] : memref<1x1x8x140xf32, #tpu.memory_space<vmem>>, vector<1x1x8x140xf32>
    %1 = vector.shape_cast %0 : vector<1x1x8x140xf32> to vector<8x140xf32>
    %c0_3 = arith.constant 0 : index
    %c0_4 = arith.constant 0 : index
    %2 = vector.load %arg3[%c0_3, %c0_4] : memref<8x1xf32, #tpu.memory_space<vmem>>, vector<8x1xf32>
    %3 = vector.broadcast %2 : vector<8x1xf32> to vector<8x140xf32>
    %4 = arith.mulf %1, %3 : vector<8x140xf32>
    %c0_5 = arith.constant 0 : index
    %c0_6 = arith.constant 0 : index
    %5 = vector.load %arg4[%c0_5, %c0_6] : memref<8x1xf32, #tpu.memory_space<vmem>>, vector<8x1xf32>
    %6 = vector.broadcast %5 : vector<8x1xf32> to vector<8x140xf32>
    %7 = arith.addf %4, %6 : vector<8x140xf32>
    %cst = arith.constant 5.000000e-01 : f32
    %8 = vector.broadcast %cst : f32 to vector<8x140xf32>
    %9 = arith.mulf %8, %7 : vector<8x140xf32>
    %cst_7 = arith.constant 0.707106769 : f32
    %10 = vector.broadcast %cst_7 : f32 to vector<8x140xf32>
    %11 = arith.mulf %7, %10 : vector<8x140xf32>
    %12 = math.erf %11 : vector<8x140xf32>
    %cst_8 = arith.constant 1.000000e+00 : f32
    %13 = vector.broadcast %cst_8 : f32 to vector<8x140xf32>
    %14 = arith.addf %13, %12 : vector<8x140xf32>
    %15 = arith.mulf %9, %14 : vector<8x140xf32>
    %c128_i32 = arith.constant 128 : i32
    %16 = arith.muli %arg1, %c128_i32 : i32
    %17 = tpu.iota {dimensions = array<i32: 1>} : vector<1x140xi32>
    %18 = vector.broadcast %16 : i32 to vector<1x140xi32>
    %19 = arith.addi %18, %17 : vector<1x140xi32>
    %c6_i32 = arith.constant 6 : i32
    %20 = vector.broadcast %c6_i32 : i32 to vector<1x140xi32>
    %21 = arith.cmpi sge, %19, %20 : vector<1x140xi32>
    %c326_i32 = arith.constant 326 : i32
    %22 = vector.broadcast %c326_i32 : i32 to vector<1x140xi32>
    %23 = arith.cmpi slt, %19, %22 : vector<1x140xi32>
    %24 = arith.andi %21, %23 : vector<1x140xi1>
    %cst_9 = arith.constant 0.000000e+00 : f32
    %25 = vector.shape_cast %24 : vector<1x140xi1> to vector<1x140xi1>
    %26 = vector.broadcast %25 : vector<1x140xi1> to vector<8x140xi1>
    %27 = vector.broadcast %cst_9 : f32 to vector<8x140xf32>
    %28 = arith.select %26, %15, %27 : vector<8x140xi1>, vector<8x140xf32>
    %29 = vector.extract_strided_slice %28 {offsets = [0, 0], sizes = [8, 128], strides = [1, 1]} : vector<8x140xf32> to vector<8x128xf32>
    %30 = vector.extract_strided_slice %28 {offsets = [0, 6], sizes = [8, 128], strides = [1, 1]} : vector<8x140xf32> to vector<8x128xf32>
    %31 = vector.extract_strided_slice %28 {offsets = [0, 12], sizes = [8, 128], strides = [1, 1]} : vector<8x140xf32> to vector<8x128xf32>
    %32 = tpu.concatenate %29, %30, %31 in 0 : vector<8x128xf32>, vector<8x128xf32>, vector<8x128xf32> -> vector<24x128xf32>
    %c0_10 = arith.constant 0 : index
    %c0_11 = arith.constant 0 : index
    %33 = vector.load %arg5[%c0_10, %c0_11] : memref<8x24xf32, #tpu.memory_space<vmem>>, vector<8x24xf32>
    %cst_12 = arith.constant dense<0.000000e+00> : vector<8x128xf32>
    %34 = tpu.matmul %33, %32, %cst_12 {dimension_numbers = #tpu.dot_dimension_numbers<[1], [0], [0], [1], [0, 0, 1, 1], [], []>} : vector<8x24xf32>, vector<24x128xf32>, vector<8x128xf32> -> vector<8x128xf32>
    %c0_13 = arith.constant 0 : index
    %c0_14 = arith.constant 0 : index
    %35 = vector.load %arg6[%c0_13, %c0_14] : memref<8x1xf32, #tpu.memory_space<vmem>>, vector<8x1xf32>
    %36 = vector.broadcast %35 : vector<8x1xf32> to vector<8x128xf32>
    %37 = arith.addf %34, %36 : vector<8x128xf32>
    %38 = vector.extract_strided_slice %1 {offsets = [0, 6], sizes = [8, 128], strides = [1, 1]} : vector<8x140xf32> to vector<8x128xf32>
    %39 = arith.addf %37, %38 : vector<8x128xf32>
    %c0_15 = arith.constant 0 : index
    %c0_16 = arith.constant 0 : index
    %c0_17 = arith.constant 0 : index
    %40 = vector.load %arg7[%c0_15, %c0_16, %c0_17] : memref<1x8x128xf32, #tpu.memory_space<vmem>>, vector<1x8x128xf32>
    %41 = vector.shape_cast %40 : vector<1x8x128xf32> to vector<8x128xf32>
    %42 = vector.shape_cast %39 : vector<8x128xf32> to vector<1x8x128xf32>
    tpu.vector_store %arg7[%c0_15, %c0_16, %c0_17], %42 {strides = array<i32>} : memref<1x8x128xf32, #tpu.memory_space<vmem>>, vector<1x8x128xf32>,
    return
  }
  func.func @transform_0(%arg0: i32, %arg1: i32) -> (i32, i32, i32, i32) {
    %c0_i32 = arith.constant 0 : i32
    %c0_i32_0 = arith.constant 0 : i32
    %c0_i32_1 = arith.constant 0 : i32
    return %arg0, %arg1, %c0_i32, %c0_i32_0 : i32, i32, i32, i32
  }
  func.func @transform_1(%arg0: i32, %arg1: i32) -> (i32, i32) {
    %c0_i32 = arith.constant 0 : i32
    %c0_i32_0 = arith.constant 0 : i32
    %c0_i32_1 = arith.constant 0 : i32
    return %c0_i32, %c0_i32_0 : i32, i32
  }
  func.func @transform_2(%arg0: i32, %arg1: i32) -> (i32, i32) {
    %c0_i32 = arith.constant 0 : i32
    %c0_i32_0 = arith.constant 0 : i32
    %c0_i32_1 = arith.constant 0 : i32
    return %c0_i32, %c0_i32_0 : i32, i32
  }
  func.func @transform_3(%arg0: i32, %arg1: i32) -> (i32, i32) {
    %c0_i32 = arith.constant 0 : i32
    %c0_i32_0 = arith.constant 0 : i32
    %c0_i32_1 = arith.constant 0 : i32
    return %c0_i32, %c0_i32_0 : i32, i32
  }
  func.func @transform_4(%arg0: i32, %arg1: i32) -> (i32, i32) {
    %c0_i32 = arith.constant 0 : i32
    %c0_i32_0 = arith.constant 0 : i32
    %c0_i32_1 = arith.constant 0 : i32
    return %c0_i32, %c0_i32_0 : i32, i32
  }
  func.func @transform_5(%arg0: i32, %arg1: i32) -> (i32, i32, i32) {
    %c0_i32 = arith.constant 0 : i32
    %c0_i32_0 = arith.constant 0 : i32
    return %arg0, %c0_i32, %arg1 : i32, i32, i32
  }
}

</mosaic_0001>

<bundles_post_ra>
// kernel: _lambda_.4
= control target key start
LH: loop header
LB: loop body
LE: loop exit
PB: predicated region body
PF: predicated region fallthrough
CT: control target
= control target key end

     0   :  { %s655_s18 = smov 0   ;;  %s657_s19 = smov 0   ;;  %s741_s0 = inlined_call_operand.vmem [shape: f32[2,3,8,132], index: 0, kind: input, shape index: {}]   ;;  %s742_s1 = inlined_call_operand.vmem [shape: f32[8,1], index: 1, kind: input, shape index: {}]   ;;  %s743_s2 = inlined_call_operand.vmem [shape: f32[8,1], index: 2, kind: input, shape index: {}]   ;;  %s744_s3 = inlined_call_operand.vmem [shape: f32[8,24], index: 3, kind: input, shape index: {}]   ;;  %s745_s4 = inlined_call_operand.vmem [shape: f32[8,1], index: 4, kind: input, shape index: {}]   ;;  %s746_s5 = inlined_call_operand.vmem [shape: f32[2,8,384], index: 5, kind: output, shape index: {}]  }
   0x1   :  { %s659_s20 = smov 0   ;;  %s661_s21 = smov 0  }
   0x2   :  { %s663_s22 = smov 0  }
   0x3 LB: > { %s24_s23 = sadd.s32 1, %s610_s20  ;;  %s27_s24 = sadd.s32 1, %s614_s21  ;;  %s618_s22 = sphi %s663_s22, %s15_s22   ;;  %s614_s21 = sphi %s661_s21, %s752_s21   ;;  %s610_s20 = sphi %s659_s20, %s751_s20   ;;  %s606_s19 = sphi %s657_s19, %s750_s19   ;;  %s602_s18 = sphi %s655_s18, %s749_s18  }
   0x4   : > { %p25_p0 = scmp.ge.s32.totalorder %s24_s23, 3  ;;  %p506_p1 = scmp.ge.s32.totalorder %s618_s22, 1 }
   0x5   : > { %p207_p2 = scmp.lt.s32.totalorder %s618_s22, 7 }
   0x6   : > { %s754_s23 = smov (%p25_p0, %s24_s23), 0  ;;  %s756_s24 = smov (!%p25_p0, %s27_s24), %s614_s21 }
   0x7   : > { %p208_p3 = pnand %p506_p1, %p207_p2  ;;  %p29_p4 = scmp.ge.s32.totalorder %s756_s24, 2 }
   0x8   : > { %p242_p5 = scmp.lt.s32.totalorder (!%p208_p3), %s606_s19, 1  ;;  %p244_p6 = scmp.lt.s32.totalorder (!%p208_p3), %s602_s18, 2 }
   0x9   : > { %s758_s24 = smov (%p29_p4, %s756_s24), 0  ;;  %211 = sbr.rel (%p208_p3) target bundleno = 492 (0x1ec), region = 40 }
   0xa   : > { %s510_s12 = sshll.u32 (!%p208_p3), %s602_s18, 7  ;;  %s623_s13 = smov (!%p208_p3), 126  }
   0xb   : > { %s624_s14 = smov (!%p208_p3), 124  }
   0xe   : > { %v261_v0 = vld [vmem:[%s742_s1] sm:$0xff]  ;;  %v620_v1 = vmov 0   ;;  %s760_s19 = smov (!%p242_p5, %s606_s19), 1  ;;  %v288_v13 = vlaneseq  ;;  %v291_v15 = vstv %s510_s12  ;;  %v621_v18 = vmov 0.0  }
   0xf   : > { %575 = vset.pattern.permute.xlu0 %v620_v1  ;;  %v269_v2 = vld [vmem:[%s743_s2] sm:$0xff]  ;;  %s697_s29 = scalar_select %p244_p6, %s602_s18, 2  ;;  %519 = vmatprep.subr.mxu0 %v621_v18  ;;  %vm622_vm5 = vmmov 0   ;;  %vm319_vm7 = vcmask 1014784   ;;  %vm312_vm8 = vcmask 1031168   ;;  %vm329_vm9 = vcmask 195584  }
  0x10   : > { %264 = vperm.xlu0 %575, %v261_v0   ;;  %s528_s30 = smul.u32 6, %s760_s19  ;;  %v289_v14 = vand.u32 127, %v288_v13  ;;  %525 = vmatprep.mubr.msk.f32.mxu0 %vm622_vm5, %v621_v18  ;;  %v323_v30 = vld [vmem:[%s745_s4] sm:$0xff] }
  0x11   : > { %s507_s6 = sshll.u32 %s697_s29, 1  ;;  %v322_v38 = vld [vmem:[%s744_s3] sm:$0xff]  ;;  %s529_s25 = smul.u32 3, %s760_s19 }
  0x12   : > { %s248_s7 = sadd.s32 %s528_s30, %s507_s6  ;;  %v292_v16 = vadd.s32 %v291_v15, %v289_v14  ;;  %v290_v17 = vadd.s32 128, %v289_v14 }
  0x13   : > { %s508_s8 = sshll.u32 %s248_s7, 3  ;;  %s256_s26 = sadd.s32 %s529_s25, %s697_s29 }
  0x14   : > { %272 = vperm.xlu0 %575, %v269_v2   ;;  %s250_s11 = scalar_lea.vmem %s741_s0, %s508_s8  ;;  %vm294_vm0 = vcmp.ge.s32.totalorder %v292_v16, 2  ;;  %vm296_vm1 = vcmp.lt.s32.totalorder %v292_v16, 322  ;;  %v293_v19 = vadd.s32 %v291_v15, %v290_v17  ;;  %s509_s27 = sshll.u32 %s256_s26, 3 }
  0x15   : > { %v259_v4 = vld [vmem:[%s250_s11] sm:$0xff]  ;;  %v260_v5 = vld [vmem:[%s250_s11 + $0x8] sm:$0xff]  ;;  %vm705_vm2 = vmand %vm294_vm0, %vm296_vm1  ;;  %s258_s6 = scalar_lea.vmem %s746_s5, %s509_s27 }
  0x16   : > { %vm295_vm3 = vcmp.ge.s32.totalorder %v293_v19, 2  ;;  %vm297_vm4 = vcmp.lt.s32.totalorder %v293_v19, 322 }
  0x17   : > { %vm299_vm6 = vmand %vm295_vm3, %vm297_vm4 }
  0x8b   : > { %v265_v3 = vpop.permute.xlu0 %264 }
  0x8c   : > { %v267_v6 = vmul.f32 %v265_v3, %v259_v4  ;;  %v268_v7 = vmul.f32 %v265_v3, %v260_v5 }
  0x8f   : > { %v273_v8 = vpop.permute.xlu0 %272 }
  0x90   : > { %v275_v9 = vadd.f32 %v273_v8, %v267_v6  ;;  %v276_v10 = vadd.f32 %v273_v8, %v268_v7 }
  0x92   : > { %v279_v11 = vmul.f32 0.70710677, %v275_v9  ;;  %v280_v12 = vmul.f32 0.70710677, %v276_v10  ;;  %v277_v22 = vmul.f32 0.5, %v275_v9  ;;  %v278_v26 = vmul.f32 0.5, %v276_v10 }
  0x94   : > { %576 = verf.f32 %v279_v11 }
  0x95   : > { %578 = verf.f32 %v280_v12 }
  0xa1   : > { %v577_v20 = vpop.eup %576 }
  0xa2   : > { %v579_v21 = vpop.eup %578  ;;  %v283_v23 = vadd.f32 1.0, %v577_v20 }
  0xa3   : > { %v284_v25 = vadd.f32 1.0, %v579_v21 }
  0xa4   : > { %v285_v27 = vmul.f32 %v283_v23, %v277_v22 }
  0xa5   : > { %v286_v29 = vmul.f32 %v284_v25, %v278_v26 }
  0xa6   : > { %v304_v28 = vsel %vm705_vm2, %v285_v27, 0.0 }
  0xa7   : > { %308 = vrot.lane.b32.xlu0 %v304_v28, %s623_s13  ;;  %315 = vrot.lane.b32.xlu1 %v304_v28, %s624_s14  ;;  %v305_v31 = vsel %vm299_vm6, %v286_v29, 0.0 }
  0xab   : > { %326 = vperm.xlu0 %575, %v323_v30   ;;  %317 = vrot.lane.b32.xlu1 %v305_v31, %s624_s14 }
  0xaf   : > { %310 = vrot.lane.b32.xlu1 %v305_v31, %s623_s13  ;;  %407 = vrot.lane.b32.xlu0 %v260_v5, %s623_s13 }
  0xb3   : > { %405 = vrot.lane.b32.xlu1 %v259_v4, %s623_s13 }
 0x119   : > { %v316_v32 = vpop.permute.xlu1 %315  ;;  %v309_v35 = vpop.permute.xlu0 %308 }
 0x11d   : > { %v318_v33 = vpop.permute.xlu1 %317 }
 0x11e   : > { %v320_v34 = vsel %vm319_vm7, %v316_v32, %v318_v33 }
 0x11f   : > { %520 = vmatpush3.msra.mxu0 %v320_v34 }
 0x120   : > { %521 = vmatprep.subr.mxu0 %v621_v18 }
 0x121   : > { %v311_v36 = vpop.permute.xlu1 %310 }
 0x122   : > { %v313_v37 = vsel %vm312_vm8, %v309_v35, %v311_v36 }
 0x123   : > { %522 = vmatpush3.msra.mxu0 %v313_v37 }
 0x124   : > { %523 = vmatprep.subr.mxu0 %v621_v18 }
 0x125   : > { %524 = vmatpush3.msk.msra.mxu0 %vm705_vm2, %v285_v27  ;;  %v406_v41 = vpop.permute.xlu1 %405 }
 0x126   : > { %526 = vmatmul.mubr.msk.f32.vlgmr.msra.gmra.mxu0 %vm329_vm9, %v322_v38  ;;  %v327_v39 = vpop.permute.xlu0 %326 }
 0x12a   : > { %v408_v40 = vpop.permute.xlu0 %407 }
 0x12b   : > { %v409_v43 = vsel %vm312_vm8, %v406_v41, %v408_v40 }
 0x1e6   : > { %v399_v42 = vpop.f32.mrf.mxu0 }
 0x1e7   : > { %v400_v44 = vadd.f32 %v399_v42, %v327_v39 }
 0x1e8   : > { %v527_v45 = vpop.f32.mrf.mxu0 }
 0x1e9   : > { %v411_v46 = vadd.f32 %v409_v43, %v400_v44 }
 0x1eb   : > { %412 = vst [vmem:[%s258_s6] sm:$0xff] %v411_v46 }
 0x1ec PF: > { %s15_s22 = sadd.s32 1, %s618_s22   ;;  %s749_s18 = smov %s610_s20 }
 0x1ed   : > { %p12_p7 = scmp.ge.s32.totalorder %s15_s22, 8   ;;  %s750_s19 = smov %s614_s21 }
 0x1ee   : > { %s751_s20 = smov %s754_s23  ;;  %s752_s21 = smov %s758_s24 }
 0x1ef   :  { %14 = sbr.rel (!%p12_p7) target bundleno = 3 (0x3), region = 70 }

// kernel: _lambda_.5
= control target key start
LH: loop header
LB: loop body
LE: loop exit
PB: predicated region body
PF: predicated region fallthrough
CT: control target
= control target key end

     0   :  { %s655_s18 = smov 0   ;;  %s657_s19 = smov 0   ;;  %s741_s0 = inlined_call_operand.vmem [shape: f32[2,3,8,134], index: 0, kind: input, shape index: {}]   ;;  %s742_s1 = inlined_call_operand.vmem [shape: f32[8,1], index: 1, kind: input, shape index: {}]   ;;  %s743_s2 = inlined_call_operand.vmem [shape: f32[8,1], index: 2, kind: input, shape index: {}]   ;;  %s744_s3 = inlined_call_operand.vmem [shape: f32[8,24], index: 3, kind: input, shape index: {}]   ;;  %s745_s4 = inlined_call_operand.vmem [shape: f32[8,1], index: 4, kind: input, shape index: {}]   ;;  %s746_s5 = inlined_call_operand.vmem [shape: f32[2,8,384], index: 5, kind: output, shape index: {}]  }
   0x1   :  { %s659_s20 = smov 0   ;;  %s661_s21 = smov 0  }
   0x2   :  { %s663_s22 = smov 0  }
   0x3 LB: > { %s24_s23 = sadd.s32 1, %s610_s20  ;;  %s27_s24 = sadd.s32 1, %s614_s21  ;;  %s618_s22 = sphi %s663_s22, %s15_s22   ;;  %s614_s21 = sphi %s661_s21, %s752_s21   ;;  %s610_s20 = sphi %s659_s20, %s751_s20   ;;  %s606_s19 = sphi %s657_s19, %s750_s19   ;;  %s602_s18 = sphi %s655_s18, %s749_s18  }
   0x4   : > { %p25_p0 = scmp.ge.s32.totalorder %s24_s23, 3  ;;  %p506_p1 = scmp.ge.s32.totalorder %s618_s22, 1 }
   0x5   : > { %p207_p2 = scmp.lt.s32.totalorder %s618_s22, 7 }
   0x6   : > { %s754_s23 = smov (%p25_p0, %s24_s23), 0  ;;  %s756_s24 = smov (!%p25_p0, %s27_s24), %s614_s21 }
   0x7   : > { %p208_p3 = pnand %p506_p1, %p207_p2  ;;  %p29_p4 = scmp.ge.s32.totalorder %s756_s24, 2 }
   0x8   : > { %p242_p5 = scmp.lt.s32.totalorder (!%p208_p3), %s606_s19, 1  ;;  %p244_p6 = scmp.lt.s32.totalorder (!%p208_p3), %s602_s18, 2 }
   0x9   : > { %s758_s24 = smov (%p29_p4, %s756_s24), 0  ;;  %211 = sbr.rel (%p208_p3) target bundleno = 492 (0x1ec), region = 40 }
   0xa   : > { %s510_s12 = sshll.u32 (!%p208_p3), %s602_s18, 7  ;;  %s623_s13 = smov (!%p208_p3), 125  }
   0xb   : > { %s624_s14 = smov (!%p208_p3), 122  }
   0xe   : > { %v261_v0 = vld [vmem:[%s742_s1] sm:$0xff]  ;;  %v620_v1 = vmov 0   ;;  %s760_s19 = smov (!%p242_p5, %s606_s19), 1  ;;  %v288_v13 = vlaneseq  ;;  %v291_v15 = vstv %s510_s12  ;;  %v621_v18 = vmov 0.0  }
   0xf   : > { %575 = vset.pattern.permute.xlu0 %v620_v1  ;;  %v269_v2 = vld [vmem:[%s743_s2] sm:$0xff]  ;;  %s697_s29 = scalar_select %p244_p6, %s602_s18, 2  ;;  %519 = vmatprep.subr.mxu0 %v621_v18  ;;  %vm622_vm5 = vmmov 0   ;;  %vm319_vm7 = vcmask 998400   ;;  %vm312_vm8 = vcmask 1022976   ;;  %vm329_vm9 = vcmask 195584  }
  0x10   : > { %264 = vperm.xlu0 %575, %v261_v0   ;;  %s528_s30 = smul.u32 6, %s760_s19  ;;  %v289_v14 = vand.u32 127, %v288_v13  ;;  %525 = vmatprep.mubr.msk.f32.mxu0 %vm622_vm5, %v621_v18  ;;  %v323_v30 = vld [vmem:[%s745_s4] sm:$0xff] }
  0x11   : > { %s507_s6 = sshll.u32 %s697_s29, 1  ;;  %v322_v38 = vld [vmem:[%s744_s3] sm:$0xff]  ;;  %s529_s25 = smul.u32 3, %s760_s19 }
  0x12   : > { %s248_s7 = sadd.s32 %s528_s30, %s507_s6  ;;  %v292_v16 = vadd.s32 %v291_v15, %v289_v14  ;;  %v290_v17 = vadd.s32 128, %v289_v14 }
  0x13   : > { %s508_s8 = sshll.u32 %s248_s7, 3  ;;  %s256_s26 = sadd.s32 %s529_s25, %s697_s29 }
  0x14   : > { %272 = vperm.xlu0 %575, %v269_v2   ;;  %s250_s11 = scalar_lea.vmem %s741_s0, %s508_s8  ;;  %vm294_vm0 = vcmp.ge.s32.totalorder %v292_v16, 3  ;;  %vm296_vm1 = vcmp.lt.s32.totalorder %v292_v16, 323  ;;  %v293_v19 = vadd.s32 %v291_v15, %v290_v17  ;;  %s509_s27 = sshll.u32 %s256_s26, 3 }
  0x15   : > { %v259_v4 = vld [vmem:[%s250_s11] sm:$0xff]  ;;  %v260_v5 = vld [vmem:[%s250_s11 + $0x8] sm:$0xff]  ;;  %vm705_vm2 = vmand %vm294_vm0, %vm296_vm1  ;;  %s258_s6 = scalar_lea.vmem %s746_s5, %s509_s27 }
  0x16   : > { %vm295_vm3 = vcmp.ge.s32.totalorder %v293_v19, 3  ;;  %vm297_vm4 = vcmp.lt.s32.totalorder %v293_v19, 323 }
  0x17   : > { %vm299_vm6 = vmand %vm295_vm3, %vm297_vm4 }
  0x8b   : > { %v265_v3 = vpop.permute.xlu0 %264 }
  0x8c   : > { %v267_v6 = vmul.f32 %v265_v3, %v259_v4  ;;  %v268_v7 = vmul.f32 %v265_v3, %v260_v5 }
  0x8f   : > { %v273_v8 = vpop.permute.xlu0 %272 }
  0x90   : > { %v275_v9 = vadd.f32 %v273_v8, %v267_v6  ;;  %v276_v10 = vadd.f32 %v273_v8, %v268_v7 }
  0x92   : > { %v279_v11 = vmul.f32 0.70710677, %v275_v9  ;;  %v280_v12 = vmul.f32 0.70710677, %v276_v10  ;;  %v277_v22 = vmul.f32 0.5, %v275_v9  ;;  %v278_v26 = vmul.f32 0.5, %v276_v10 }
  0x94   : > { %576 = verf.f32 %v279_v11 }
  0x95   : > { %578 = verf.f32 %v280_v12 }
  0xa1   : > { %v577_v20 = vpop.eup %576 }
  0xa2   : > { %v579_v21 = vpop.eup %578  ;;  %v283_v23 = vadd.f32 1.0, %v577_v20 }
  0xa3   : > { %v284_v25 = vadd.f32 1.0, %v579_v21 }
  0xa4   : > { %v285_v27 = vmul.f32 %v283_v23, %v277_v22 }
  0xa5   : > { %v286_v29 = vmul.f32 %v284_v25, %v278_v26 }
  0xa6   : > { %v304_v28 = vsel %vm705_vm2, %v285_v27, 0.0 }
  0xa7   : > { %308 = vrot.lane.b32.xlu0 %v304_v28, %s623_s13  ;;  %315 = vrot.lane.b32.xlu1 %v304_v28, %s624_s14  ;;  %v305_v31 = vsel %vm299_vm6, %v286_v29, 0.0 }
  0xab   : > { %326 = vperm.xlu0 %575, %v323_v30   ;;  %317 = vrot.lane.b32.xlu1 %v305_v31, %s624_s14 }
  0xaf   : > { %310 = vrot.lane.b32.xlu1 %v305_v31, %s623_s13  ;;  %407 = vrot.lane.b32.xlu0 %v260_v5, %s623_s13 }
  0xb3   : > { %405 = vrot.lane.b32.xlu1 %v259_v4, %s623_s13 }
 0x119   : > { %v316_v32 = vpop.permute.xlu1 %315  ;;  %v309_v35 = vpop.permute.xlu0 %308 }
 0x11d   : > { %v318_v33 = vpop.permute.xlu1 %317 }
 0x11e   : > { %v320_v34 = vsel %vm319_vm7, %v316_v32, %v318_v33 }
 0x11f   : > { %520 = vmatpush3.msra.mxu0 %v320_v34 }
 0x120   : > { %521 = vmatprep.subr.mxu0 %v621_v18 }
 0x121   : > { %v311_v36 = vpop.permute.xlu1 %310 }
 0x122   : > { %v313_v37 = vsel %vm312_vm8, %v309_v35, %v311_v36 }
 0x123   : > { %522 = vmatpush3.msra.mxu0 %v313_v37 }
 0x124   : > { %523 = vmatprep.subr.mxu0 %v621_v18 }
 0x125   : > { %524 = vmatpush3.msk.msra.mxu0 %vm705_vm2, %v285_v27  ;;  %v406_v41 = vpop.permute.xlu1 %405 }
 0x126   : > { %526 = vmatmul.mubr.msk.f32.vlgmr.msra.gmra.mxu0 %vm329_vm9, %v322_v38  ;;  %v327_v39 = vpop.permute.xlu0 %326 }
 0x12a   : > { %v408_v40 = vpop.permute.xlu0 %407 }
 0x12b   : > { %v409_v43 = vsel %vm312_vm8, %v406_v41, %v408_v40 }
 0x1e6   : > { %v399_v42 = vpop.f32.mrf.mxu0 }
 0x1e7   : > { %v400_v44 = vadd.f32 %v399_v42, %v327_v39 }
 0x1e8   : > { %v527_v45 = vpop.f32.mrf.mxu0 }
 0x1e9   : > { %v411_v46 = vadd.f32 %v409_v43, %v400_v44 }
 0x1eb   : > { %412 = vst [vmem:[%s258_s6] sm:$0xff] %v411_v46 }
 0x1ec PF: > { %s15_s22 = sadd.s32 1, %s618_s22   ;;  %s749_s18 = smov %s610_s20 }
 0x1ed   : > { %p12_p7 = scmp.ge.s32.totalorder %s15_s22, 8   ;;  %s750_s19 = smov %s614_s21 }
 0x1ee   : > { %s751_s20 = smov %s754_s23  ;;  %s752_s21 = smov %s758_s24 }
 0x1ef   :  { %14 = sbr.rel (!%p12_p7) target bundleno = 3 (0x3), region = 70 }

// kernel: _lambda_.6
= control target key start
LH: loop header
LB: loop body
LE: loop exit
PB: predicated region body
PF: predicated region fallthrough
CT: control target
= control target key end

     0   :  { %s655_s18 = smov 0   ;;  %s657_s19 = smov 0   ;;  %s741_s0 = inlined_call_operand.vmem [shape: f32[2,3,8,136], index: 0, kind: input, shape index: {}]   ;;  %s742_s1 = inlined_call_operand.vmem [shape: f32[8,1], index: 1, kind: input, shape index: {}]   ;;  %s743_s2 = inlined_call_operand.vmem [shape: f32[8,1], index: 2, kind: input, shape index: {}]   ;;  %s744_s3 = inlined_call_operand.vmem [shape: f32[8,24], index: 3, kind: input, shape index: {}]   ;;  %s745_s4 = inlined_call_operand.vmem [shape: f32[8,1], index: 4, kind: input, shape index: {}]   ;;  %s746_s5 = inlined_call_operand.vmem [shape: f32[2,8,384], index: 5, kind: output, shape index: {}]  }
   0x1   :  { %s659_s20 = smov 0   ;;  %s661_s21 = smov 0  }
   0x2   :  { %s663_s22 = smov 0  }
   0x3 LB: > { %s24_s23 = sadd.s32 1, %s610_s20  ;;  %s27_s24 = sadd.s32 1, %s614_s21  ;;  %s618_s22 = sphi %s663_s22, %s15_s22   ;;  %s614_s21 = sphi %s661_s21, %s752_s21   ;;  %s610_s20 = sphi %s659_s20, %s751_s20   ;;  %s606_s19 = sphi %s657_s19, %s750_s19   ;;  %s602_s18 = sphi %s655_s18, %s749_s18  }
   0x4   : > { %p25_p0 = scmp.ge.s32.totalorder %s24_s23, 3  ;;  %p506_p1 = scmp.ge.s32.totalorder %s618_s22, 1 }
   0x5   : > { %p207_p2 = scmp.lt.s32.totalorder %s618_s22, 7 }
   0x6   : > { %s754_s23 = smov (%p25_p0, %s24_s23), 0  ;;  %s756_s24 = smov (!%p25_p0, %s27_s24), %s614_s21 }
   0x7   : > { %p208_p3 = pnand %p506_p1, %p207_p2  ;;  %p29_p4 = scmp.ge.s32.totalorder %s756_s24, 2 }
   0x8   : > { %p242_p5 = scmp.lt.s32.totalorder (!%p208_p3), %s606_s19, 1  ;;  %p244_p6 = scmp.lt.s32.totalorder (!%p208_p3), %s602_s18, 2 }
   0x9   : > { %s758_s24 = smov (%p29_p4, %s756_s24), 0  ;;  %211 = sbr.rel (%p208_p3) target bundleno = 492 (0x1ec), region = 40 }
   0xa   : > { %s510_s12 = sshll.u32 (!%p208_p3), %s602_s18, 7  ;;  %s623_s13 = smov (!%p208_p3), 124  }
   0xb   : > { %s624_s14 = smov (!%p208_p3), 120  }
   0xe   : > { %v261_v0 = vld [vmem:[%s742_s1] sm:$0xff]  ;;  %v620_v1 = vmov 0   ;;  %s760_s19 = smov (!%p242_p5, %s606_s19), 1  ;;  %v288_v13 = vlaneseq  ;;  %v291_v15 = vstv %s510_s12  ;;  %v621_v18 = vmov 0.0  }
   0xf   : > { %575 = vset.pattern.permute.xlu0 %v620_v1  ;;  %v269_v2 = vld [vmem:[%s743_s2] sm:$0xff]  ;;  %s697_s29 = scalar_select %p244_p6, %s602_s18, 2  ;;  %519 = vmatprep.subr.mxu0 %v621_v18  ;;  %vm622_vm5 = vmmov 0   ;;  %vm319_vm7 = vcmask 982016   ;;  %vm312_vm8 = vcmask 1014784   ;;  %vm329_vm9 = vcmask 195584  }
  0x10   : > { %264 = vperm.xlu0 %575, %v261_v0   ;;  %s528_s30 = smul.u32 6, %s760_s19  ;;  %v289_v14 = vand.u32 127, %v288_v13  ;;  %525 = vmatprep.mubr.msk.f32.mxu0 %vm622_vm5, %v621_v18  ;;  %v323_v30 = vld [vmem:[%s745_s4] sm:$0xff] }
  0x11   : > { %s507_s6 = sshll.u32 %s697_s29, 1  ;;  %v322_v38 = vld [vmem:[%s744_s3] sm:$0xff]  ;;  %s529_s25 = smul.u32 3, %s760_s19 }
  0x12   : > { %s248_s7 = sadd.s32 %s528_s30, %s507_s6  ;;  %v292_v16 = vadd.s32 %v291_v15, %v289_v14  ;;  %v290_v17 = vadd.s32 128, %v289_v14 }
  0x13   : > { %s508_s8 = sshll.u32 %s248_s7, 3  ;;  %s256_s26 = sadd.s32 %s529_s25, %s697_s29 }
  0x14   : > { %272 = vperm.xlu0 %575, %v269_v2   ;;  %s250_s11 = scalar_lea.vmem %s741_s0, %s508_s8  ;;  %vm294_vm0 = vcmp.ge.s32.totalorder %v292_v16, 4  ;;  %vm296_vm1 = vcmp.lt.s32.totalorder %v292_v16, 324  ;;  %v293_v19 = vadd.s32 %v291_v15, %v290_v17  ;;  %s509_s27 = sshll.u32 %s256_s26, 3 }
  0x15   : > { %v259_v4 = vld [vmem:[%s250_s11] sm:$0xff]  ;;  %v260_v5 = vld [vmem:[%s250_s11 + $0x8] sm:$0xff]  ;;  %vm705_vm2 = vmand %vm294_vm0, %vm296_vm1  ;;  %s258_s6 = scalar_lea.vmem %s746_s5, %s509_s27 }
  0x16   : > { %vm295_vm3 = vcmp.ge.s32.totalorder %v293_v19, 4  ;;  %vm297_vm4 = vcmp.lt.s32.totalorder %v293_v19, 324 }
  0x17   : > { %vm299_vm6 = vmand %vm295_vm3, %vm297_vm4 }
  0x8b   : > { %v265_v3 = vpop.permute.xlu0 %264 }
  0x8c   : > { %v267_v6 = vmul.f32 %v265_v3, %v259_v4  ;;  %v268_v7 = vmul.f32 %v265_v3, %v260_v5 }
  0x8f   : > { %v273_v8 = vpop.permute.xlu0 %272 }
  0x90   : > { %v275_v9 = vadd.f32 %v273_v8, %v267_v6  ;;  %v276_v10 = vadd.f32 %v273_v8, %v268_v7 }
  0x92   : > { %v279_v11 = vmul.f32 0.70710677, %v275_v9  ;;  %v280_v12 = vmul.f32 0.70710677, %v276_v10  ;;  %v277_v22 = vmul.f32 0.5, %v275_v9  ;;  %v278_v26 = vmul.f32 0.5, %v276_v10 }
  0x94   : > { %576 = verf.f32 %v279_v11 }
  0x95   : > { %578 = verf.f32 %v280_v12 }
  0xa1   : > { %v577_v20 = vpop.eup %576 }
  0xa2   : > { %v579_v21 = vpop.eup %578  ;;  %v283_v23 = vadd.f32 1.0, %v577_v20 }
  0xa3   : > { %v284_v25 = vadd.f32 1.0, %v579_v21 }
  0xa4   : > { %v285_v27 = vmul.f32 %v283_v23, %v277_v22 }
  0xa5   : > { %v286_v29 = vmul.f32 %v284_v25, %v278_v26 }
  0xa6   : > { %v304_v28 = vsel %vm705_vm2, %v285_v27, 0.0 }
  0xa7   : > { %308 = vrot.lane.b32.xlu0 %v304_v28, %s623_s13  ;;  %315 = vrot.lane.b32.xlu1 %v304_v28, %s624_s14  ;;  %v305_v31 = vsel %vm299_vm6, %v286_v29, 0.0 }
  0xab   : > { %326 = vperm.xlu0 %575, %v323_v30   ;;  %317 = vrot.lane.b32.xlu1 %v305_v31, %s624_s14 }
  0xaf   : > { %310 = vrot.lane.b32.xlu1 %v305_v31, %s623_s13  ;;  %407 = vrot.lane.b32.xlu0 %v260_v5, %s623_s13 }
  0xb3   : > { %405 = vrot.lane.b32.xlu1 %v259_v4, %s623_s13 }
 0x119   : > { %v316_v32 = vpop.permute.xlu1 %315  ;;  %v309_v35 = vpop.permute.xlu0 %308 }
 0x11d   : > { %v318_v33 = vpop.permute.xlu1 %317 }
 0x11e   : > { %v320_v34 = vsel %vm319_vm7, %v316_v32, %v318_v33 }
 0x11f   : > { %520 = vmatpush3.msra.mxu0 %v320_v34 }
 0x120   : > { %521 = vmatprep.subr.mxu0 %v621_v18 }
 0x121   : > { %v311_v36 = vpop.permute.xlu1 %310 }
 0x122   : > { %v313_v37 = vsel %vm312_vm8, %v309_v35, %v311_v36 }
 0x123   : > { %522 = vmatpush3.msra.mxu0 %v313_v37 }
 0x124   : > { %523 = vmatprep.subr.mxu0 %v621_v18 }
 0x125   : > { %524 = vmatpush3.msk.msra.mxu0 %vm705_vm2, %v285_v27  ;;  %v406_v41 = vpop.permute.xlu1 %405 }
 0x126   : > { %526 = vmatmul.mubr.msk.f32.vlgmr.msra.gmra.mxu0 %vm329_vm9, %v322_v38  ;;  %v327_v39 = vpop.permute.xlu0 %326 }
 0x12a   : > { %v408_v40 = vpop.permute.xlu0 %407 }
 0x12b   : > { %v409_v43 = vsel %vm312_vm8, %v406_v41, %v408_v40 }
 0x1e6   : > { %v399_v42 = vpop.f32.mrf.mxu0 }
 0x1e7   : > { %v400_v44 = vadd.f32 %v399_v42, %v327_v39 }
 0x1e8   : > { %v527_v45 = vpop.f32.mrf.mxu0 }
 0x1e9   : > { %v411_v46 = vadd.f32 %v409_v43, %v400_v44 }
 0x1eb   : > { %412 = vst [vmem:[%s258_s6] sm:$0xff] %v411_v46 }
 0x1ec PF: > { %s15_s22 = sadd.s32 1, %s618_s22   ;;  %s749_s18 = smov %s610_s20 }
 0x1ed   : > { %p12_p7 = scmp.ge.s32.totalorder %s15_s22, 8   ;;  %s750_s19 = smov %s614_s21 }
 0x1ee   : > { %s751_s20 = smov %s754_s23  ;;  %s752_s21 = smov %s758_s24 }
 0x1ef   :  { %14 = sbr.rel (!%p12_p7) target bundleno = 3 (0x3), region = 70 }

// kernel: _lambda_.7
= control target key start
LH: loop header
LB: loop body
LE: loop exit
PB: predicated region body
PF: predicated region fallthrough
CT: control target
= control target key end

     0   :  { %10 = vsyncpa [#allocation3], 0  ;;  %s890_s0 = inlined_call_operand.vmem [shape: f32[2,3,8,140], index: 0, kind: input, shape index: {}]   ;;  %s891_s1 = inlined_call_operand.vmem [shape: f32[8,1], index: 1, kind: input, shape index: {}]   ;;  %s892_s2 = inlined_call_operand.vmem [shape: f32[8,1], index: 2, kind: input, shape index: {}]   ;;  %s893_s3 = inlined_call_operand.vmem [shape: f32[8,24], index: 3, kind: input, shape index: {}]   ;;  %s894_s4 = inlined_call_operand.vmem [shape: f32[8,1], index: 4, kind: input, shape index: {}]   ;;  %s895_s5 = inlined_call_operand.hbm [shape: f32[2,8,384], index: 5, kind: output, shape index: {}]  }
   0x1   :  { %12 = vsyncpa [#allocation3 + $0x1], 0  ;;  %s743_s18 = smov 0   ;;  %s745_s19 = smov 0  }
   0x2   :  { %s747_s20 = smov 0   ;;  %s749_s21 = smov 0  }
   0x3   :  { %s751_s22 = smov 0   ;;  %s753_s23 = smov 0  }
   0x4   :  { %s755_s24 = smov 0   ;;  %s757_s25 = smov 0  }
   0x5 LB: > { %s502_s26 = sadd.s32 4294967295, %s705_s25   ;;  %s503_s27 = sadd.s32 4294967294, %s705_s25   ;;  %s705_s25 = sphi %s757_s25, %s18_s25   ;;  %s701_s24 = sphi %s755_s24, %s906_s24   ;;  %s697_s23 = sphi %s753_s23, %s905_s23   ;;  %s693_s22 = sphi %s751_s22, %s904_s22   ;;  %s689_s21 = sphi %s749_s21, %s903_s21   ;;  %s685_s20 = sphi %s747_s20, %s902_s20   ;;  %s681_s19 = sphi %s745_s19, %s901_s19   ;;  %s677_s18 = sphi %s743_s18, %s900_s18  }
   0x6   : > { %s27_s28 = sadd.s32 1, %s697_s23  ;;  %s30_s29 = sadd.s32 1, %s701_s24 }
   0x7   : > { %p28_p0 = scmp.ge.s32.totalorder %s27_s28, 3  ;;  %p161_p1 = scmp.ne.s32.totalorder %s685_s20, %s681_s19 }
   0x8   : > { %p162_p2 = scmp.eq.s32.totalorder %s502_s26, 5  ;;  %p167_p5 = scmp.ne.s32.totalorder %s681_s19, %s677_s18 }
   0x9   : > { %s908_s28 = smov (%p28_p0, %s27_s28), 0  ;;  %s910_s29 = smov (!%p28_p0, %s30_s29), %s701_s24 }
   0xa   : > { %s147_s30 = ssub.s32 %s697_s23, %s908_s28  ;;  %p794_p3 = por %p162_p2, %p161_p1 }
   0xb   : > { %p32_p4 = scmp.ge.s32.totalorder %s910_s29, 2  ;;  %p168_p6 = scmp.eq.s32.totalorder %s503_s27, 5 }
   0xc   : > { %p506_p7 = scmp.ge.s32.totalorder %s705_s25, 1  ;;  %p210_p9 = scmp.lt.s32.totalorder %s705_s25, 7 }
   0xd   : > { %s912_s29 = smov (%p32_p4, %s910_s29), 0  ;;  %p803_p8 = por %p168_p6, %p167_p5 }
   0xe   : > { %s146_s8 = ssub.s32 %s701_s24, %s912_s29  ;;  %s151_s9 = sadd.s32 1, %s685_s20 }
   0xf   : > { %s148_s10 = sor.u32 %s147_s30, %s146_s8  ;;  %p211_p10 = pnand %p506_p7, %p210_p9 }
  0x10   : > { %p149_p11 = scmp.eq.s32.totalorder %s148_s10, 0  ;;  %p242_p12 = scmp.lt.s32.totalorder (!%p211_p10), %s693_s22, 1 }
  0x11   : > { %214 = sbr.rel (%p211_p10) target bundleno = 512 (0x200), region = 40  ;;  %p244_p13 = scmp.lt.s32.totalorder (!%p211_p10), %s689_s21, 2 }
  0x12   : > { %s812_s11 = scalar_select %p149_p11, %s685_s20, %s151_s9  }
  0x13   : > { %s510_s13 = sshll.u32 (!%p211_p10), %s689_s21, 7  ;;  %s710_s14 = smov (!%p211_p10), 122  }
  0x14   : > { %s711_s15 = smov (!%p211_p10), 116  }
  0x16   : > { %v253_v0 = vld [vmem:[%s891_s1] sm:$0xff]  ;;  %v707_v1 = vmov 0   ;;  %s243_s16 = scalar_select %p242_p12, %s693_s22, 1  ;;  %v280_v13 = vlaneseq  ;;  %v283_v15 = vstv %s510_s13  ;;  %v708_v18 = vmov 0.0  }
  0x17   : > { %608 = vset.pattern.permute.xlu0 %v707_v1  ;;  %v261_v2 = vld [vmem:[%s892_s2] sm:$0xff]  ;;  %s245_s17 = scalar_select %p244_p13, %s689_s21, 2  ;;  %521 = vmatprep.subr.mxu0 %v708_v18  ;;  %vm709_vm5 = vmmov 0   ;;  %vm311_vm7 = vcmask 949248   ;;  %vm304_vm8 = vcmask 998400   ;;  %vm321_vm9 = vcmask 195584  }
  0x18   : > { %256 = vperm.xlu0 %608, %v253_v0   ;;  %s530_s26 = smul.u32 6, %s243_s16  ;;  %v281_v14 = vand.u32 127, %v280_v13  ;;  %527 = vmatprep.mubr.msk.f32.mxu0 %vm709_vm5, %v708_v18  ;;  %v315_v30 = vld [vmem:[%s894_s4] sm:$0xff] }
  0x19   : > { %s508_s27 = sshll.u32 %s245_s17, 1  ;;  %v314_v38 = vld [vmem:[%s893_s3] sm:$0xff] }
  0x1a   : > { %s248_s30 = sadd.s32 %s530_s26, %s508_s27  ;;  %v284_v16 = vadd.s32 %v283_v15, %v281_v14  ;;  %v282_v17 = vadd.s32 128, %v281_v14 }
  0x1b   : > { %s509_s8 = sshll.u32 %s248_s30, 3  ;;  %s239_s30 = sand.u32 1, %s681_s19  }
  0x1c   : > { %264 = vperm.xlu0 %608, %v261_v2   ;;  %s250_s12 = scalar_lea.vmem %s890_s0, %s509_s8  ;;  %vm286_vm0 = vcmp.ge.s32.totalorder %v284_v16, 6  ;;  %vm288_vm1 = vcmp.lt.s32.totalorder %v284_v16, 326  ;;  %v285_v19 = vadd.s32 %v283_v15, %v282_v17  ;;  %s531_s8 = smul.u32 3, %s693_s22 }
  0x1d   : > { %v251_v4 = vld [vmem:[%s250_s12] sm:$0xff]  ;;  %v252_v5 = vld [vmem:[%s250_s12 + $0x8] sm:$0xff]  ;;  %vm828_vm2 = vmand %vm286_vm0, %vm288_vm1  ;;  %s507_s9 = sshll.u32 %s239_s30, 3  ;;  %s406_s22 = scalar_lea.sflag [#allocation3], %s239_s30 }
  0x1e   : > { %vm287_vm3 = vcmp.ge.s32.totalorder %v285_v19, 6  ;;  %vm289_vm4 = vcmp.lt.s32.totalorder %v285_v19, 326  ;;  %s417_s10 = sadd.s32 %s689_s21, %s531_s8  ;;  %s241_s13 = scalar_lea.vmem [#allocation2], %s507_s9 }
  0x1f   : > { %vm291_vm6 = vmand %vm287_vm3, %vm289_vm4  ;;  %s514_s12 = sshll.u32 %s417_s10, 7  ;;  %s712_s21 = smov [#allocation2]  }
  0x20   : > { %s419_s17 = scalar_lea.hbm %s895_s5, %s514_s12  ;;  %s617_s27 = sshll.u32 %s712_s21, 4  ;;  %s618_s27 = int_to_ptr.vmem [resolvable:$false] %s617_s27 }
  0x21   : > { %s619_s8 = scalar_lea.vmem %s618_s27, 256 }
  0x93   : > { %v257_v3 = vpop.permute.xlu0 %256 }
  0x94   : > { %v259_v6 = vmul.f32 %v257_v3, %v251_v4  ;;  %v260_v7 = vmul.f32 %v257_v3, %v252_v5 }
  0x97   : > { %v265_v8 = vpop.permute.xlu0 %264 }
  0x98   : > { %v267_v9 = vadd.f32 %v265_v8, %v259_v6  ;;  %v268_v10 = vadd.f32 %v265_v8, %v260_v7 }
  0x9a   : > { %v271_v11 = vmul.f32 0.70710677, %v267_v9  ;;  %v272_v12 = vmul.f32 0.70710677, %v268_v10  ;;  %v269_v22 = vmul.f32 0.5, %v267_v9  ;;  %v270_v26 = vmul.f32 0.5, %v268_v10 }
  0x9c   : > { %609 = verf.f32 %v271_v11 }
  0x9d   : > { %611 = verf.f32 %v272_v12 }
  0xa9   : > { %v610_v20 = vpop.eup %609 }
  0xaa   : > { %v612_v21 = vpop.eup %611  ;;  %v275_v23 = vadd.f32 1.0, %v610_v20 }
  0xab   : > { %v276_v25 = vadd.f32 1.0, %v612_v21 }
  0xac   : > { %v277_v27 = vmul.f32 %v275_v23, %v269_v22 }
  0xad   : > { %v278_v29 = vmul.f32 %v276_v25, %v270_v26 }
  0xae   : > { %v296_v28 = vsel %vm828_vm2, %v277_v27, 0.0 }
  0xaf   : > { %300 = vrot.lane.b32.xlu0 %v296_v28, %s710_s14  ;;  %307 = vrot.lane.b32.xlu1 %v296_v28, %s711_s15  ;;  %v297_v31 = vsel %vm291_vm6, %v278_v29, 0.0 }
  0xb3   : > { %318 = vperm.xlu0 %608, %v315_v30   ;;  %309 = vrot.lane.b32.xlu1 %v297_v31, %s711_s15 }
  0xb7   : > { %302 = vrot.lane.b32.xlu1 %v297_v31, %s710_s14  ;;  %399 = vrot.lane.b32.xlu0 %v252_v5, %s710_s14 }
  0xbb   : > { %397 = vrot.lane.b32.xlu1 %v251_v4, %s710_s14  ;;  %s421_s14 = sshll.u32 %s241_s13, 4  ;;  %s422_s14 = int_to_ptr.vmem [resolvable:$true] %s421_s14 }
  0xbc   : > { %s613_s26 = scalar_lea.vmem %s422_s14, 128  ;;  %p620_p4 = scmp.lt.s32.totalorder %s422_s14, %s618_s27 }
  0xbd   : > { %p614_p0 = scmp.ne.s32.totalorder %s422_s14, %s613_s26  ;;  %p621_p5 = scmp.lt.s32.totalorder %s619_s8, %s613_s26 }
  0xbf   : > { %p615_p1 = pnand %p614_p0, %p794_p3  ;;  %p622_p6 = por %p621_p5, %p620_p4 }
  0xc1   : > { %p616_p2 = pneg %p615_p1 }
  0xc3   : > { %p623_p7 = pnand %p622_p6, %p616_p2 }
 0x121   : > { %v308_v32 = vpop.permute.xlu1 %307  ;;  %v301_v35 = vpop.permute.xlu0 %300 }
 0x125   : > { %v310_v33 = vpop.permute.xlu1 %309 }
 0x126   : > { %v312_v34 = vsel %vm311_vm7, %v308_v32, %v310_v33 }
 0x127   : > { %522 = vmatpush3.msra.mxu0 %v312_v34 }
 0x128   : > { %523 = vmatprep.subr.mxu0 %v708_v18 }
 0x129   : > { %v303_v36 = vpop.permute.xlu1 %302 }
 0x12a   : > { %v305_v37 = vsel %vm304_vm8, %v301_v35, %v303_v36 }
 0x12b   : > { %524 = vmatpush3.msra.mxu0 %v305_v37 }
 0x12c   : > { %525 = vmatprep.subr.mxu0 %v708_v18 }
 0x12d   : > { %526 = vmatpush3.msk.msra.mxu0 %vm828_vm2, %v277_v27  ;;  %v398_v41 = vpop.permute.xlu1 %397 }
 0x12e   : > { %528 = vmatmul.mubr.msk.f32.vlgmr.msra.gmra.mxu0 %vm321_vm9, %v314_v38  ;;  %v319_v39 = vpop.permute.xlu0 %318 }
 0x132   : > { %v400_v40 = vpop.permute.xlu0 %399 }
 0x133   : > { %v401_v43 = vsel %vm304_vm8, %v398_v41, %v400_v40 }
 0x1ee   : > { %v391_v42 = vpop.f32.mrf.mxu0 }
 0x1ef   : > { %v392_v44 = vadd.f32 %v391_v42, %v319_v39 }
 0x1f0   : > { %v529_v45 = vpop.f32.mrf.mxu0 }
 0x1f1   : > { %v403_v46 = vadd.f32 %v401_v43, %v392_v44 }
 0x1f3   : > { %404 = vst [vmem:[%s241_s13] sm:$0xff] %v403_v46 }
 0x1f4   : > { %626 = shalt.err (!%p623_p7)
}
 0x1f5   : > { %s627_s9 = scalar_lea.hbm %s419_s17, 128  ;;  %s631_s12 = scalar_lea.hbm %s895_s5, 768 }
 0x1f6   : > { %p628_p9 = scmp.ne.s32.totalorder %s419_s17, %s627_s9  ;;  %p632_p12 = scmp.lt.s32.totalorder %s419_s17, %s895_s5 }
 0x1f7   : > { %p633_p13 = scmp.lt.s32.totalorder %s631_s12, %s627_s9 }
 0x1f8   : > { %p629_p10 = pnand %p628_p9, %p794_p3 }
 0x1f9   : > { %p634_p0 = por %p633_p13, %p632_p12 }
 0x1fa   : > { %p630_p11 = pneg %p629_p10 }
 0x1fc   : > { %p635_p1 = pnand %p634_p0, %p630_p11 }
 0x1fe   : > { %638 = shalt.err (!%p635_p1)
}
 0x1ff   : > { %532 = dma.vmem_to_hbm [thread:$0]  (%p794_p3), %s422_s14, 128, %s419_s17, %s406_s22  }
 0x200 PF: > { %p538_p2 = scmp.ge.s32.totalorder %s705_s25, 2  ;;  %s433_s16 = sand.u32 1, %s677_s18  }
 0x201   : > { %s434_s26 = scalar_lea.sflag [#allocation3], %s433_s16 }
 0x202   : > { %p535_p4 = pnand %p538_p2, %p803_p8 }
 0x204   : > { %p536_p5 = pneg %p535_p4 }
 0x206   : > { %672 = dma.done.wait (%p536_p5), %s434_s26, 128  }
 0x207   : > { %674 = vsyncadd (%p536_p5), %s434_s26, 4294967168  ;;  %s18_s25 = sadd.s32 1, %s705_s25   ;;  %s900_s18 = smov %s681_s19 }
 0x208   : > { %p15_p6 = scmp.ge.s32.totalorder %s18_s25, 8   ;;  %s901_s19 = smov %s685_s20 }
 0x209   : > { %s902_s20 = smov %s812_s11  ;;  %s903_s21 = smov %s697_s23 }
 0x20a   : > { %s904_s22 = smov %s701_s24  ;;  %s905_s23 = smov %s908_s28 }
 0x20b   : > { %s906_s24 = smov %s912_s29  ;;  %17 = sbr.rel (!%p15_p6) target bundleno = 5 (0x5), region = 75 }
 0x210   :  { %439 = vsyncpa [#allocation3], 1 }
 0x211   :  { %441 = vsyncpa [#allocation3 + $0x1], 1 }

</bundles_post_ra>
